<compile_context>
chip_gen: v7x
topology: tpu7x:2x2x1
jax: 0.10.0
libtpu: 0.0.40
codegen_flags: <defaults>
</compile_context>

<pallas_src>
import functools

import jax
import jax.numpy as jnp
from jax.experimental import pallas as pl
from jax.experimental.pallas import tpu as pltpu


# ---------------------------------------------------------------------------
# Generic PreNorm: standalone Pallas LayerNorm + arbitrary fn
# ---------------------------------------------------------------------------
def _layernorm_kernel(x_ref, gamma_ref, beta_ref, o_ref, *, eps):
    x = x_ref[...].astype(jnp.float32)                          # (tm, dim)
    mu = jnp.mean(x, axis=-1, keepdims=True)
    xc = x - mu
    var = jnp.mean(xc * xc, axis=-1, keepdims=True)             # biased, like torch
    xn = xc * jax.lax.rsqrt(var + eps)
    y = xn * gamma_ref[...].astype(jnp.float32) + beta_ref[...].astype(jnp.float32)
    o_ref[...] = y.astype(o_ref.dtype)


def layernorm_pallas(x, gamma, beta, *, eps=1e-5, block_rows=512):
    """nn.LayerNorm(dim) over the last axis of x (any leading shape)."""
    orig_shape = x.shape
    dim = orig_shape[-1]
    x2 = x.reshape(-1, dim)
    m = x2.shape[0]
    assert block_rows % 8 == 0
    # Memory-bound op: large row tiles for HBM-roofline utilization; a
    # non-divisible tail is zero-padded and sliced off afterwards (never a
    # single giant un-pipelined block, never a non-8-divisible tile).
    if m > block_rows:
        tm = block_rows
        grid_m = pl.cdiv(m, tm)
        m_pad = grid_m * tm
        if m_pad != m:
            x2 = jnp.pad(x2, ((0, m_pad - m), (0, 0)))
    else:
        tm, grid_m, m_pad = m, 1, m
    # TODO(synk): model dims that are not multiples of 128 lower to masked
    # vst.msk partial stores; real 128-multiple dims hit the fast store path.
    out = pl.pallas_call(
        functools.partial(_layernorm_kernel, eps=eps),
        out_shape=jax.ShapeDtypeStruct((m_pad, dim), x.dtype),
        grid=(grid_m,),
        in_specs=[
            pl.BlockSpec((tm, dim), lambda i: (i, 0)),
            pl.BlockSpec((1, dim), lambda i: (0, 0)),
            pl.BlockSpec((1, dim), lambda i: (0, 0)),
        ],
        out_specs=pl.BlockSpec((tm, dim), lambda i: (i, 0)),
        compiler_params=pltpu.CompilerParams(
            dimension_semantics=("parallel",),
            vmem_limit_bytes=64 * 1024 * 1024),
    )(x2, gamma.reshape(1, dim), beta.reshape(1, dim))
    return out[:m].reshape(orig_shape)


def prenorm(x, gamma, beta, fn, *, eps=1e-5, **fn_kwargs):
    """PreNorm.forward: fn(LayerNorm(x), **kwargs) for an arbitrary callable fn."""
    return fn(layernorm_pallas(x, gamma, beta, eps=eps), **fn_kwargs)


# ---------------------------------------------------------------------------
# Fused PreNorm(Attention): one pallas_call, grid = (batch, heads)
# ---------------------------------------------------------------------------
def _prenorm_attention_kernel(x_ref, gamma_ref, beta_ref, wqkv_ref, wout_ref,
                              bout_ref, mask_ref, o_ref, xn_ref, acc_ref, *, eps):
    h = pl.program_id(1)
    n_heads = pl.num_programs(1)

    # ---- LayerNorm (PreNorm.norm): once per batch element, reused by heads --
    @pl.when(h == 0)
    def _():
        x = x_ref[...].astype(jnp.float32)                      # (N, dim)
        mu = jnp.mean(x, axis=-1, keepdims=True)
        xc = x - mu
        var = jnp.mean(xc * xc, axis=-1, keepdims=True)         # biased, like torch
        xn = xc * jax.lax.rsqrt(var + eps)
        xn = (xn * gamma_ref[...].astype(jnp.float32)
              + beta_ref[...].astype(jnp.float32))
        xn_ref[...] = xn.astype(xn_ref.dtype)                   # MXU/weight dtype
        # Initialize the output-projection accumulator with the bias.
        acc_ref[...] = jnp.broadcast_to(
            bout_ref[...].astype(jnp.float32), acc_ref.shape)

    xn = xn_ref[...]                                            # (N, dim)
    mm = xn.dtype                                               # MXU operand dtype

    # ---- this head's q/k/v (softmax scale pre-folded into W_q host-side) ----
    # wqkv_ref is (3, dim, Dh): full aligned blocks, no column slicing.
    q = jnp.dot(xn, wqkv_ref[0], preferred_element_type=jnp.float32)   # (N, Dh)
    k = jnp.dot(xn, wqkv_ref[1], preferred_element_type=jnp.float32)
    v = jnp.dot(xn, wqkv_ref[2], preferred_element_type=jnp.float32)

    # ---- scores: q @ k^T (contract Dh axes, no materialized transpose) ------
    dots = jax.lax.dot_general(q.astype(mm), k.astype(mm),
                               (((1,), (1,)), ((), ())),
                               preferred_element_type=jnp.float32)      # (N, N)

    # Bernoulli(0.5) logit knockout of this Attention (int8 mask, 1 => knock out).
    dots = jnp.where(mask_ref[...] != 0, jnp.float32(-1e12), dots)

    # Numerically stable softmax over keys (f32 VPU/EUP math on every chip).
    dots = dots - jnp.max(dots, axis=-1, keepdims=True)
    e = jnp.exp(dots)
    attn = e * pl.reciprocal(jnp.sum(e, axis=-1, keepdims=True), approx=True)

    oh = jnp.dot(attn.astype(mm), v.astype(mm),
                 preferred_element_type=jnp.float32)                    # (N, Dh)

    # ---- fold this head straight into the output projection -----------------
    # out @ W_out == sum_h oh @ W_out[h]  (no concat/transpose of head outputs)
    acc_ref[...] += jnp.dot(oh.astype(mm), wout_ref[...],
                            preferred_element_type=jnp.float32)

    @pl.when(h == n_heads - 1)
    def _():
        o_ref[...] = acc_ref[...].astype(o_ref.dtype)
    # TODO(synk): add flash-style KV tiling (online softmax, KV grid axis with
    # pl.when init/finalize) for N where the (N, N) score tile exceeds VMEM.


def prenorm_attention_forward(x, gamma, beta, w_qkv, w_out, b_out, knockout_mask,
                              *, heads, dim_head, eps=1e-5):
    """PreNorm(dim, Attention(dim, heads, dim_head)).forward(x), fully fused."""
    B, N, dim = x.shape
    inner = heads * dim_head
    scale = dim_head ** -0.5

    project_out = not (heads == 1 and dim_head == dim)
    if not project_out:
        # Attention.to_out is nn.Identity() in this configuration.
        w_out = jnp.eye(inner, dtype=w_qkv.dtype)
        b_out = jnp.zeros((dim,), dtype=w_qkv.dtype)

    # Host-side layout plumbing (one-time, outside the kernel):
    #   W_qkv (dim, 3*inner) -> (heads, 3, dim, Dh), scale folded into W_q.
    #   W_out (inner, dim)   -> (heads, Dh, dim).
    w_qkv_perm = jnp.transpose(w_qkv.reshape(dim, 3, heads, dim_head),
                               (2, 1, 0, 3))                    # (heads, 3, dim, Dh)
    w_qkv_perm = w_qkv_perm.at[:, 0].multiply(scale)
    w_out_perm = w_out.reshape(heads, dim_head, dim)            # (heads, Dh, dim)

    # Knockout mask travels as int8 (drawn host-side; on-device PRNG optional).
    mask_i8 = (knockout_mask != 0).astype(jnp.int8)

    kernel = functools.partial(_prenorm_attention_kernel, eps=eps)
    # TODO(synk): constant-index resident blocks (gamma/beta/b_out/x across
    # heads) could use pipeline_mode=pl.Buffered(1) to drop double-buffering.
    return pl.pallas_call(
        kernel,
        out_shape=jax.ShapeDtypeStruct((B, N, dim), x.dtype),
        grid=(B, heads),
        in_specs=[
            pl.BlockSpec((None, N, dim), lambda b, h: (b, 0, 0)),           # x
            pl.BlockSpec((1, dim), lambda b, h: (0, 0)),                    # gamma
            pl.BlockSpec((1, dim), lambda b, h: (0, 0)),                    # beta
            pl.BlockSpec((None, 3, dim, dim_head), lambda b, h: (h, 0, 0, 0)),  # W_qkv[h]
            pl.BlockSpec((None, dim_head, dim), lambda b, h: (h, 0, 0)),    # W_out[h]
            pl.BlockSpec((1, dim), lambda b, h: (0, 0)),                    # b_out
            pl.BlockSpec((None, None, N, N), lambda b, h: (b, h, 0, 0)),    # mask[b, h]
        ],
        out_specs=pl.BlockSpec((None, N, dim), lambda b, h: (b, 0, 0)),
        scratch_shapes=[
            pltpu.VMEM((N, dim), w_qkv.dtype),    # LayerNorm output (MXU dtype)
            pltpu.VMEM((N, dim), jnp.float32),    # output-projection accumulator
        ],
        compiler_params=pltpu.CompilerParams(
            dimension_semantics=("parallel", "arbitrary"),
            vmem_limit_bytes=64 * 1024 * 1024),
    )(x, gamma.reshape(1, dim), beta.reshape(1, dim), w_qkv_perm, w_out_perm,
      b_out.reshape(1, dim), mask_i8)


# ---------------------------------------------------------------------------
# Pure-JAX reference for the fused path
# ---------------------------------------------------------------------------
def prenorm_attention_reference(x, gamma, beta, w_qkv, w_out, b_out, mask,
                                *, heads, dim_head, eps=1e-5):
    B, N, dim = x.shape
    inner = heads * dim_head
    scale = dim_head ** -0.5
    mu = x.mean(-1, keepdims=True)
    var = ((x - mu) ** 2).mean(-1, keepdims=True)
    xn = (x - mu) / jnp.sqrt(var + eps) * gamma + beta
    qkv = xn @ w_qkv
    q, k, v = jnp.split(qkv, 3, axis=-1)
    split_heads = lambda t: t.reshape(B, N, heads, dim_head).transpose(0, 2, 1, 3)
    q, k, v = map(split_heads, (q, k, v))
    dots = jnp.einsum("bhnd,bhmd->bhnm", q, k) * scale
    dots = jnp.where(mask.astype(bool), -1e12, dots)
    attn = jax.nn.softmax(dots, axis=-1)
    out = jnp.einsum("bhnm,bhmd->bhnd", attn, v)
    out = out.transpose(0, 2, 1, 3).reshape(B, N, inner)
    if not (heads == 1 and dim_head == dim):
        out = out @ w_out + b_out
    return out


# ---------------------------------------------------------------------------
if __name__ == "__main__":
    # Small shapes consistent with the module: x is (b, n, dim).
    B, N, dim = 2, 8, 32
    heads, dim_head = 2, 16
    inner = heads * dim_head

    key = jax.random.PRNGKey(0)
    ks = jax.random.split(key, 7)
    x = jax.random.normal(ks[0], (B, N, dim), dtype=jnp.float32)
    gamma = 1.0 + 0.1 * jax.random.normal(ks[1], (dim,), dtype=jnp.float32)
    beta = 0.1 * jax.random.normal(ks[2], (dim,), dtype=jnp.float32)
    # Weights stored as (in, out) = W^T of the PyTorch parameters.
    w_qkv = 0.1 * jax.random.normal(ks[3], (dim, 3 * inner), dtype=jnp.float32)
    w_out = 0.1 * jax.random.normal(ks[4], (inner, dim), dtype=jnp.float32)
    b_out = 0.1 * jax.random.normal(ks[5], (dim,), dtype=jnp.float32)
    # Deterministic Bernoulli(0.5) logit-knockout mask of the example Attention
    # fn, drawn host-side (kept host-side so interpret-mode testing also works).
    mask = jax.random.bernoulli(ks[6], 0.5, (B, heads, N, N))

    # Fused PreNorm(Attention) Pallas kernel.
    y = prenorm_attention_forward(x, gamma, beta, w_qkv, w_out, b_out, mask,
                                  heads=heads, dim_head=dim_head)
    jax.block_until_ready(y)
    assert y.shape == (B, N, dim)
    assert bool(jnp.all(jnp.isfinite(y)))

    # Cross-check vs. pure-JAX reference (loose tol: default-precision MXU f32
    # plus the approx EUP reciprocal in the softmax).
    y_ref = prenorm_attention_reference(x, gamma, beta, w_qkv, w_out, b_out, mask,
                                        heads=heads, dim_head=dim_head)
    assert bool(jnp.allclose(y, y_ref, atol=5e-2, rtol=5e-2)), \
        float(jnp.max(jnp.abs(y - y_ref)))

    # Generic PreNorm path: Pallas LayerNorm + arbitrary fn (identity here).
    xn = prenorm(x, gamma, beta, fn=lambda z: z)
    mu = x.mean(-1, keepdims=True)
    var = ((x - mu) ** 2).mean(-1, keepdims=True)
    xn_ref = (x - mu) / jnp.sqrt(var + 1e-5) * gamma + beta
    assert bool(jnp.allclose(xn, xn_ref, atol=1e-4, rtol=1e-4))

    print("KERNEL_OK")
</pallas_src>

<mosaic_0001>
module attributes {stable_mosaic.version = 11 : i64} {
  func.func @_prenorm_attention_kernel(%arg0: i32, %arg1: i32, %arg2: memref<1x8x32xf32, #tpu.memory_space<vmem>>, %arg3: memref<1x32xf32, #tpu.memory_space<vmem>>, %arg4: memref<1x32xf32, #tpu.memory_space<vmem>>, %arg5: memref<1x3x32x16xf32, #tpu.memory_space<vmem>>, %arg6: memref<1x16x32xf32, #tpu.memory_space<vmem>>, %arg7: memref<1x32xf32, #tpu.memory_space<vmem>>, %arg8: memref<1x1x8x8xi8, #tpu.memory_space<vmem>>, %arg9: memref<1x8x32xf32, #tpu.memory_space<vmem>>, %arg10: memref<8x32xf32, #tpu.memory_space<vmem>>, %arg11: memref<8x32xf32, #tpu.memory_space<vmem>>) attributes {dimension_semantics = [#tpu.dimension_semantics<parallel>, #tpu.dimension_semantics<arbitrary>], iteration_bounds = array<i64: 2, 2>, scalar_prefetch = 0 : i64, scratch_operands = 2 : i64, tpu.core_type = #tpu.core_type<tc>, window_params = [{transform_indices = @transform_0, window_bounds = array<i64: 1, 8, 32>}, {pipeline_mode = #tpu.pipeline_mode<synchronous>, transform_indices = @transform_1, window_bounds = array<i64: 1, 32>}, {pipeline_mode = #tpu.pipeline_mode<synchronous>, transform_indices = @transform_2, window_bounds = array<i64: 1, 32>}, {transform_indices = @transform_3, window_bounds = array<i64: 1, 3, 32, 16>}, {transform_indices = @transform_4, window_bounds = array<i64: 1, 16, 32>}, {pipeline_mode = #tpu.pipeline_mode<synchronous>, transform_indices = @transform_5, window_bounds = array<i64: 1, 32>}, {transform_indices = @transform_6, window_bounds = array<i64: 1, 1, 8, 8>}, {transform_indices = @transform_7, window_bounds = array<i64: 1, 8, 32>}]} {
    %c0_i32 = arith.constant 0 : i32
    %0 = arith.cmpi eq, %arg1, %c0_i32 : i32
    %1 = arith.extui %0 : i1 to i32
    %c0_i32_0 = arith.constant 0 : i32
    %2 = arith.cmpi ne, %1, %c0_i32_0 : i32
    scf.if %2 {
      %c0_32 = arith.constant 0 : index
      %c0_33 = arith.constant 0 : index
      %c0_34 = arith.constant 0 : index
      %40 = vector.load %arg2[%c0_32, %c0_33, %c0_34] : memref<1x8x32xf32, #tpu.memory_space<vmem>>, vector<1x8x32xf32>
      %41 = vector.shape_cast %40 : vector<1x8x32xf32> to vector<8x32xf32>
      %cst_35 = arith.constant dense<0.000000e+00> : vector<8xf32>
      %42 = vector.multi_reduction <add>, %41, %cst_35 [1] : vector<8x32xf32> to vector<8xf32>
      %43 = vector.shape_cast %42 : vector<8xf32> to vector<8x1xf32>
      %cst_36 = arith.constant 3.200000e+01 : f32
      %44 = vector.broadcast %cst_36 : f32 to vector<8x1xf32>
      %45 = arith.divf %43, %44 : vector<8x1xf32>
      %46 = vector.broadcast %45 : vector<8x1xf32> to vector<8x32xf32>
      %47 = arith.subf %41, %46 : vector<8x32xf32>
      %48 = arith.mulf %47, %47 : vector<8x32xf32>
      %cst_37 = arith.constant dense<0.000000e+00> : vector<8xf32>
      %49 = vector.multi_reduction <add>, %48, %cst_37 [1] : vector<8x32xf32> to vector<8xf32>
      %50 = vector.shape_cast %49 : vector<8xf32> to vector<8x1xf32>
      %cst_38 = arith.constant 3.200000e+01 : f32
      %51 = vector.broadcast %cst_38 : f32 to vector<8x1xf32>
      %52 = arith.divf %50, %51 : vector<8x1xf32>
      %cst_39 = arith.constant 9.99999974E-6 : f32
      %53 = vector.broadcast %cst_39 : f32 to vector<8x1xf32>
      %54 = arith.addf %52, %53 : vector<8x1xf32>
      %55 = math.rsqrt %54 : vector<8x1xf32>
      %56 = vector.broadcast %55 : vector<8x1xf32> to vector<8x32xf32>
      %57 = arith.mulf %47, %56 : vector<8x32xf32>
      %c0_40 = arith.constant 0 : index
      %c0_41 = arith.constant 0 : index
      %58 = vector.load %arg3[%c0_40, %c0_41] : memref<1x32xf32, #tpu.memory_space<vmem>>, vector<1x32xf32>
      %59 = vector.broadcast %58 : vector<1x32xf32> to vector<8x32xf32>
      %60 = arith.mulf %57, %59 : vector<8x32xf32>
      %c0_42 = arith.constant 0 : index
      %c0_43 = arith.constant 0 : index
      %61 = vector.load %arg4[%c0_42, %c0_43] : memref<1x32xf32, #tpu.memory_space<vmem>>, vector<1x32xf32>
      %62 = vector.broadcast %61 : vector<1x32xf32> to vector<8x32xf32>
      %63 = arith.addf %60, %62 : vector<8x32xf32>
      %c0_44 = arith.constant 0 : index
      %c0_45 = arith.constant 0 : index
      %64 = vector.load %arg10[%c0_44, %c0_45] : memref<8x32xf32, #tpu.memory_space<vmem>>, vector<8x32xf32>
      tpu.vector_store %arg10[%c0_44, %c0_45], %63 {strides = array<i32>} : memref<8x32xf32, #tpu.memory_space<vmem>>, vector<8x32xf32>,
      %c0_46 = arith.constant 0 : index
      %c0_47 = arith.constant 0 : index
      %65 = vector.load %arg7[%c0_46, %c0_47] : memref<1x32xf32, #tpu.memory_space<vmem>>, vector<1x32xf32>
      %66 = vector.shape_cast %65 : vector<1x32xf32> to vector<1x32xf32>
      %67 = vector.broadcast %66 : vector<1x32xf32> to vector<8x32xf32>
      %c0_48 = arith.constant 0 : index
      %c0_49 = arith.constant 0 : index
      %68 = vector.load %arg11[%c0_48, %c0_49] : memref<8x32xf32, #tpu.memory_space<vmem>>, vector<8x32xf32>
      tpu.vector_store %arg11[%c0_48, %c0_49], %67 {strides = array<i32>} : memref<8x32xf32, #tpu.memory_space<vmem>>, vector<8x32xf32>,
    } else {
    }
    %c0 = arith.constant 0 : index
    %c0_1 = arith.constant 0 : index
    %3 = vector.load %arg10[%c0, %c0_1] : memref<8x32xf32, #tpu.memory_space<vmem>>, vector<8x32xf32>
    %c0_2 = arith.constant 0 : index
    %c0_3 = arith.constant 0 : index
    %c0_4 = arith.constant 0 : index
    %c0_5 = arith.constant 0 : index
    %4 = vector.load %arg5[%c0_2, %c0_3, %c0_4, %c0_5] : memref<1x3x32x16xf32, #tpu.memory_space<vmem>>, vector<1x1x32x16xf32>
    %5 = vector.shape_cast %4 : vector<1x1x32x16xf32> to vector<32x16xf32>
    %cst = arith.constant dense<0.000000e+00> : vector<8x16xf32>
    %6 = tpu.matmul %3, %5, %cst {dimension_numbers = #tpu.dot_dimension_numbers<[1], [0], [0], [1], [0, 0, 1, 1], [], []>} : vector<8x32xf32>, vector<32x16xf32>, vector<8x16xf32> -> vector<8x16xf32>
    %c0_6 = arith.constant 0 : index
    %c1 = arith.constant 1 : index
    %c0_7 = arith.constant 0 : index
    %c0_8 = arith.constant 0 : index
    %7 = vector.load %arg5[%c0_6, %c1, %c0_7, %c0_8] : memref<1x3x32x16xf32, #tpu.memory_space<vmem>>, vector<1x1x32x16xf32>
    %8 = vector.shape_cast %7 : vector<1x1x32x16xf32> to vector<32x16xf32>
    %cst_9 = arith.constant dense<0.000000e+00> : vector<8x16xf32>
    %9 = tpu.matmul %3, %8, %cst_9 {dimension_numbers = #tpu.dot_dimension_numbers<[1], [0], [0], [1], [0, 0, 1, 1], [], []>} : vector<8x32xf32>, vector<32x16xf32>, vector<8x16xf32> -> vector<8x16xf32>
    %c0_10 = arith.constant 0 : index
    %c2 = arith.constant 2 : index
    %c0_11 = arith.constant 0 : index
    %c0_12 = arith.constant 0 : index
    %10 = vector.load %arg5[%c0_10, %c2, %c0_11, %c0_12] : memref<1x3x32x16xf32, #tpu.memory_space<vmem>>, vector<1x1x32x16xf32>
    %11 = vector.shape_cast %10 : vector<1x1x32x16xf32> to vector<32x16xf32>
    %cst_13 = arith.constant dense<0.000000e+00> : vector<8x16xf32>
    %12 = tpu.matmul %3, %11, %cst_13 {dimension_numbers = #tpu.dot_dimension_numbers<[1], [0], [0], [1], [0, 0, 1, 1], [], []>} : vector<8x32xf32>, vector<32x16xf32>, vector<8x16xf32> -> vector<8x16xf32>
    %cst_14 = arith.constant dense<0.000000e+00> : vector<8x8xf32>
    %13 = tpu.matmul %6, %9, %cst_14 {dimension_numbers = #tpu.dot_dimension_numbers<[1], [1], [0], [0], [0, 0, 1, 0], [], []>} : vector<8x16xf32>, vector<8x16xf32>, vector<8x8xf32> -> vector<8x8xf32>
    %c0_15 = arith.constant 0 : index
    %c0_16 = arith.constant 0 : index
    %c0_17 = arith.constant 0 : index
    %c0_18 = arith.constant 0 : index
    %14 = vector.load %arg8[%c0_15, %c0_16, %c0_17, %c0_18] : memref<1x1x8x8xi8, #tpu.memory_space<vmem>>, vector<1x1x8x8xi8>
    %15 = vector.shape_cast %14 : vector<1x1x8x8xi8> to vector<8x8xi8>
    %c0_i8 = arith.constant 0 : i8
    %16 = vector.broadcast %c0_i8 : i8 to vector<8x8xi8>
    %17 = arith.cmpi ne, %15, %16 : vector<8x8xi8>
    %cst_19 = arith.constant -9.99999995E+11 : f32
    %18 = vector.broadcast %cst_19 : f32 to vector<8x8xf32>
    %19 = arith.select %17, %18, %13 : vector<8x8xi1>, vector<8x8xf32>
    %cst_20 = arith.constant dense<0xFF800000> : vector<8xf32>
    %20 = vector.multi_reduction <maximumf>, %19, %cst_20 [1] : vector<8x8xf32> to vector<8xf32>
    %21 = vector.shape_cast %20 : vector<8xf32> to vector<8x1xf32>
    %22 = vector.broadcast %21 : vector<8x1xf32> to vector<8x8xf32>
    %23 = arith.subf %19, %22 : vector<8x8xf32>
    %24 = math.exp %23 : vector<8x8xf32>
    %cst_21 = arith.constant dense<0.000000e+00> : vector<8xf32>
    %25 = vector.multi_reduction <add>, %24, %cst_21 [1] : vector<8x8xf32> to vector<8xf32>
    %26 = vector.shape_cast %25 : vector<8xf32> to vector<8x1xf32>
    %27 = tpu.reciprocal %26 {approx = true} : vector<8x1xf32> -> vector<8x1xf32>
    %28 = vector.broadcast %27 : vector<8x1xf32> to vector<8x8xf32>
    %29 = arith.mulf %24, %28 : vector<8x8xf32>
    %cst_22 = arith.constant dense<0.000000e+00> : vector<8x16xf32>
    %30 = tpu.matmul %29, %12, %cst_22 {dimension_numbers = #tpu.dot_dimension_numbers<[1], [0], [0], [1], [0, 0, 1, 1], [], []>} : vector<8x8xf32>, vector<8x16xf32>, vector<8x16xf32> -> vector<8x16xf32>
    %c0_23 = arith.constant 0 : index
    %c0_24 = arith.constant 0 : index
    %31 = vector.load %arg11[%c0_23, %c0_24] : memref<8x32xf32, #tpu.memory_space<vmem>>, vector<8x32xf32>
    %c0_25 = arith.constant 0 : index
    %c0_26 = arith.constant 0 : index
    %c0_27 = arith.constant 0 : index
    %32 = vector.load %arg6[%c0_25, %c0_26, %c0_27] : memref<1x16x32xf32, #tpu.memory_space<vmem>>, vector<1x16x32xf32>
    %33 = vector.shape_cast %32 : vector<1x16x32xf32> to vector<16x32xf32>
    %cst_28 = arith.constant dense<0.000000e+00> : vector<8x32xf32>
    %34 = tpu.matmul %30, %33, %cst_28 {dimension_numbers = #tpu.dot_dimension_numbers<[1], [0], [0], [1], [0, 0, 1, 1], [], []>} : vector<8x16xf32>, vector<16x32xf32>, vector<8x32xf32> -> vector<8x32xf32>
    %35 = arith.addf %31, %34 : vector<8x32xf32>
    %c0_29 = arith.constant 0 : index
    %c0_30 = arith.constant 0 : index
    %36 = vector.load %arg11[%c0_29, %c0_30] : memref<8x32xf32, #tpu.memory_space<vmem>>, vector<8x32xf32>
    tpu.vector_store %arg11[%c0_29, %c0_30], %35 {strides = array<i32>} : memref<8x32xf32, #tpu.memory_space<vmem>>, vector<8x32xf32>,
    %c1_i32 = arith.constant 1 : i32
    %37 = arith.cmpi eq, %arg1, %c1_i32 : i32
    %38 = arith.extui %37 : i1 to i32
    %c0_i32_31 = arith.constant 0 : i32
    %39 = arith.cmpi ne, %38, %c0_i32_31 : i32
    scf.if %39 {
      %c0_32 = arith.constant 0 : index
      %c0_33 = arith.constant 0 : index
      %40 = vector.load %arg11[%c0_32, %c0_33] : memref<8x32xf32, #tpu.memory_space<vmem>>, vector<8x32xf32>
      %c0_34 = arith.constant 0 : index
      %c0_35 = arith.constant 0 : index
      %c0_36 = arith.constant 0 : index
      %41 = vector.load %arg9[%c0_34, %c0_35, %c0_36] : memref<1x8x32xf32, #tpu.memory_space<vmem>>, vector<1x8x32xf32>
      %42 = vector.shape_cast %41 : vector<1x8x32xf32> to vector<8x32xf32>
      %43 = vector.shape_cast %40 : vector<8x32xf32> to vector<1x8x32xf32>
      tpu.vector_store %arg9[%c0_34, %c0_35, %c0_36], %43 {strides = array<i32>} : memref<1x8x32xf32, #tpu.memory_space<vmem>>, vector<1x8x32xf32>,
    } else {
    }
    return
  }
  func.func @transform_0(%arg0: i32, %arg1: i32) -> (i32, i32, i32) {
    %c0_i32 = arith.constant 0 : i32
    %c0_i32_0 = arith.constant 0 : i32
    %c0_i32_1 = arith.constant 0 : i32
    return %arg0, %c0_i32, %c0_i32_0 : i32, i32, i32
  }
  func.func @transform_1(%arg0: i32, %arg1: i32) -> (i32, i32) {
    %c0_i32 = arith.constant 0 : i32
    %c0_i32_0 = arith.constant 0 : i32
    %c0_i32_1 = arith.constant 0 : i32
    return %c0_i32, %c0_i32_0 : i32, i32
  }
  func.func @transform_2(%arg0: i32, %arg1: i32) -> (i32, i32) {
    %c0_i32 = arith.constant 0 : i32
    %c0_i32_0 = arith.constant 0 : i32
    %c0_i32_1 = arith.constant 0 : i32
    return %c0_i32, %c0_i32_0 : i32, i32
  }
  func.func @transform_3(%arg0: i32, %arg1: i32) -> (i32, i32, i32, i32) {
    %c0_i32 = arith.constant 0 : i32
    %c0_i32_0 = arith.constant 0 : i32
    %c0_i32_1 = arith.constant 0 : i32
    %c0_i32_2 = arith.constant 0 : i32
    return %arg1, %c0_i32, %c0_i32_0, %c0_i32_1 : i32, i32, i32, i32
  }
  func.func @transform_4(%arg0: i32, %arg1: i32) -> (i32, i32, i32) {
    %c0_i32 = arith.constant 0 : i32
    %c0_i32_0 = arith.constant 0 : i32
    %c0_i32_1 = arith.constant 0 : i32
    return %arg1, %c0_i32, %c0_i32_0 : i32, i32, i32
  }
  func.func @transform_5(%arg0: i32, %arg1: i32) -> (i32, i32) {
    %c0_i32 = arith.constant 0 : i32
    %c0_i32_0 = arith.constant 0 : i32
    %c0_i32_1 = arith.constant 0 : i32
    return %c0_i32, %c0_i32_0 : i32, i32
  }
  func.func @transform_6(%arg0: i32, %arg1: i32) -> (i32, i32, i32, i32) {
    %c0_i32 = arith.constant 0 : i32
    %c0_i32_0 = arith.constant 0 : i32
    %c0_i32_1 = arith.constant 0 : i32
    return %arg0, %arg1, %c0_i32, %c0_i32_0 : i32, i32, i32, i32
  }
  func.func @transform_7(%arg0: i32, %arg1: i32) -> (i32, i32, i32) {
    %c0_i32 = arith.constant 0 : i32
    %c0_i32_0 = arith.constant 0 : i32
    %c0_i32_1 = arith.constant 0 : i32
    return %arg0, %c0_i32, %c0_i32_0 : i32, i32, i32
  }
}

</mosaic_0001>

<bundles_post_ra>
// kernel: tpu_custom_call.1
= control target key start
LH: loop header
LB: loop body
LE: loop exit
PB: predicated region body
PF: predicated region fallthrough
CT: control target
= control target key end

     0   :  { %s2512_s0 = inlined_call_operand.hbm [shape: f32[2,8,32], index: 0, kind: input, shape index: {}]   ;;  %s2513_s1 = inlined_call_operand.hbm [shape: f32[1,32], index: 1, kind: input, shape index: {}]   ;;  %s2514_s2 = inlined_call_operand.hbm [shape: f32[1,32], index: 2, kind: input, shape index: {}]   ;;  %s2515_s3 = inlined_call_operand.hbm [shape: f32[2,3,32,16], index: 3, kind: input, shape index: {}]   ;;  %s2516_s4 = inlined_call_operand.hbm [shape: f32[2,16,32], index: 4, kind: input, shape index: {}]   ;;  %s2517_s5 = inlined_call_operand.hbm [shape: f32[1,32], index: 5, kind: input, shape index: {}]   ;;  %s2518_s6 = inlined_call_operand.hbm [shape: s8[2,2,8,8], index: 6, kind: input, shape index: {}]   ;;  %s2519_s7 = inlined_call_operand.hbm [shape: f32[2,8,32], index: 7, kind: output, shape index: {}]  }
   0x1   :  { %2550 = sst [smem:[#allocation40_spill]] %s2512_s0 }
   0x2   :  { %2551 = sst [smem:[#allocation41_spill]] %s2513_s1 }
   0x3   :  { %2552 = sst [smem:[#allocation42_spill]] %s2515_s3 }
   0x4   :  { %2553 = sst [smem:[#allocation43_spill]] %s2518_s6 }
   0x5   :  { %2554 = sst [smem:[#allocation44_spill]] %s2519_s7 }
   0x6   :  { %12 = vsyncpa [#allocation5], 0 }
   0x7   :  { %14 = vsyncpa [#allocation5 + $0x1], 0 }
   0x8   :  { %15 = vsyncpa [#allocation8], 0 }
   0x9   :  { %16 = vsyncpa [#allocation11], 0 }
   0xa   :  { %18 = vsyncpa [#allocation11 + $0x1], 0 }
   0xb   :  { %19 = vsyncpa [#allocation14], 0 }
   0xc   :  { %20 = vsyncpa [#allocation6], 0 }
   0xd   :  { %22 = vsyncpa [#allocation6 + $0x1], 0  ;;  %s1927_s24 = smov 0   ;;  %s1929_s25 = smov 0  }
   0xe   :  { %s1931_s26 = smov 0   ;;  %s1933_s27 = smov 0  }
   0xf   :  { %s1935_s28 = smov 0   ;;  %s1937_s29 = smov 0  }
  0x10   :  { %s1939_s30 = smov 0   ;;  %s1941_s8 = smov 0  }
  0x11   :  { %s1943_s9 = smov 0   ;;  %s1945_s10 = smov 0  }
  0x12   :  { %s1947_s11 = smov 0   ;;  %s1949_s12 = smov 0  }
  0x13   :  { %s1951_s13 = smov 0   ;;  %s1953_s14 = smov 0  }
  0x14 LB: > { %2555 = sst [smem:[#allocation23_spill]] %s1819_s24  ;;  %s1998_s15 = sadd.s32 4294967295, %s1871_s14   ;;  %s1871_s14 = sphi %s1953_s14, %s28_s14   ;;  %s1867_s13 = sphi %s1951_s13, %s2645_s13   ;;  %s1863_s12 = sphi %s1949_s12, %s2644_s12   ;;  %s1859_s11 = sphi %s1947_s11, %s2643_s11   ;;  %s1855_s10 = sphi %s1945_s10, %s2642_s10   ;;  %s1851_s9 = sphi %s1943_s9, %s2632_s9   ;;  %s1847_s8 = sphi %s1941_s8, %s2641_s8   ;;  %s1843_s30 = sphi %s1939_s30, %s2640_s30   ;;  %s1839_s29 = sphi %s1937_s29, %s2630_s29   ;;  %s1835_s28 = sphi %s1935_s28, %s2639_s28   ;;  %s1831_s27 = sphi %s1933_s27, %s2638_s27   ;;  %s1827_s26 = sphi %s1931_s26, %s2637_s26   ;;  %s1823_s25 = sphi %s1929_s25, %s2636_s25   ;;  %s1819_s24 = sphi %s1927_s24, %s2635_s24  }
  0x15   : > { %2556 = sst [smem:[#allocation24_spill]] %s1823_s25  ;;  %p1178_p0 = scmp.ge.s32.totalorder %s1871_s14, 1 }
  0x16   : > { %2557 = sst [smem:[#allocation25_spill]] %s1839_s29  ;;  %p2521_p1 = scmp.eq.s32.totalorder %s1998_s15, 0 }
  0x17   : > { %2558 = sst [smem:[#allocation26_spill]] %s1843_s30  ;;  %p240_p2 = scmp.lt.s32.totalorder %s1871_s14, 5 }
  0x18   : > { %2559 = sst [smem:[#allocation27_spill]] %s1851_s9  ;;  %s1873_s17 = smov [#allocation7]  }
  0x19   : > { %2560 = sst [smem:[#allocation28_spill]] %s1855_s10  ;;  %p2003_p3 = pnand %p1178_p0, %p240_p2 }
  0x1a   : > { %2561 = sst [smem:[#allocation29_spill]] %s1859_s11  ;;  %s253_s18 = sshll.u32 %s1873_s17, 4  ;;  %s254_s18 = int_to_ptr.vmem [resolvable:$true] %s253_s18 }
  0x1b   : > { %s2562_s16 = scalar_select %p2003_p3, 1, 0 }
  0x1c   : > { %p1343_p4 = pneg %p2003_p3  ;;  %s2565_s1 = sld [smem:[#allocation41_spill]] }
  0x1d   : > { %2563 = sst [smem:[#allocation30_spill]] %s2562_s16 }
  0x1e   : > { %p2011_p5 = pnand %p1343_p4, %p2521_p1 }
  0x20   : > { %s2564_s19 = scalar_select %p2011_p5, 1, 0 }
  0x21   : > { %p2023_p7 = pneg %p2011_p5 }
  0x22   : > { %s1505_s22 = scalar_lea.hbm %s2565_s1, 16 }
  0x23   : > { %p1506_p6 = scmp.ne.s32.totalorder %s2565_s1, %s1505_s22  ;;  %p1512_p10 = scmp.lt.u32.totalorder %s1505_s22, %s2565_s1 }
  0x25   : > { %p1508_p8 = pnand %p2023_p7, %p1506_p6 }
  0x27   : > { %p1509_p9 = pneg %p1508_p8 }
  0x29   : > { %p1514_p11 = pnand %p1512_p10, %p1509_p9 }
  0x2b   : > { %1517 = shalt.err (!%p1514_p11)
}
  0x2c   : > { %s1518_s20 = scalar_lea.vmem %s254_s18, 16  ;;  %s1525_s7 = scalar_lea.vmem %s254_s18, 32 }
  0x2d   : > { %p1519_p12 = scmp.ne.s32.totalorder %s254_s18, %s1518_s20  ;;  %p1526_p2 = scmp.lt.s32.totalorder %s254_s18, %s254_s18 }
  0x2e   : > { %p1527_p4 = scmp.lt.s32.totalorder %s1525_s7, %s1518_s20 }
  0x2f   : > { %p1521_p13 = pnand %p1519_p12, %p2023_p7 }
  0x30   : > { %p1528_p1 = por %p1527_p4, %p1526_p2 }
  0x31   : > { %p1522_p0 = pneg %p1521_p13 }
  0x33   : > { %p1529_p3 = pnand %p1528_p1, %p1522_p0 }
  0x35   : > { %1532 = shalt.err (!%p1529_p3)
}
  0x36   : > { %1346 = dma.hbm_to_vmem [thread:$0]  (!%p2011_p5), %s2565_s1, 16, %s254_s18, [#allocation8]  }
  0x37   : > { %s1177_s10 = sadd.s32 4294967294, %s1871_s14   ;;  %s37_s11 = sadd.s32 1, %s1863_s12 }
  0x38   : > { %s40_s22 = sadd.s32 1, %s1867_s13  ;;  %p38_p1 = scmp.ge.s32.totalorder %s37_s11, 2 }
  0x39   : > { %s47_s20 = sadd.s32 1, %s1851_s9  ;;  %p54_p3 = scmp.ne.s32.totalorder %s1851_s9, %s1847_s8 }
  0x3a   : > { %p2523_p6 = scmp.eq.s32.totalorder %s1871_s14, 0  ;;  %s2647_s11 = smov (%p38_p1, %s37_s11), 0 }
  0x3b   : > { %2567 = sst [smem:[#allocation31_spill]] %s2647_s11  ;;  %s2649_s22 = smov (!%p38_p1, %s40_s22), %s1867_s13 }
  0x3c   : > { %p2054_p8 = por %p2523_p6, %p54_p3  ;;  %p60_p9 = scmp.ne.s32.totalorder %s1847_s8, %s1843_s30 }
  0x3d   : > { %p42_p10 = scmp.ge.s32.totalorder %s2649_s22, 2  ;;  %s2062_s7 = ssub.s32 %s1863_s12, %s2647_s11 }
  0x3e   : > { %p2569_p11 = scmp.eq.s32.totalorder %s1998_s15, 0  ;;  %p227_p0 = scmp.eq.s32.totalorder %s1998_s15, 3 }
  0x3f   : > { %s2651_s22 = smov (%p42_p10, %s2649_s22), 0  ;;  %p233_p2 = scmp.eq.s32.totalorder %s1177_s10, 3 }
  0x40   : > { %p2069_p12 = por %p2569_p11, %p60_p9  ;;  %2572 = sst [smem:[#allocation33_spill]] %s2651_s22 }
  0x41   : > { %s44_s23 = ssub.s32 %s1867_s13, %s2651_s22  ;;  %p2533_p4 = scmp.lt.s32.totalorder %s1871_s14, 4 }
  0x42   : > { %s2570_s21 = scalar_select %p2069_p12, 1, 0 }
  0x43   : > { %p45_p1 = scmp.eq.s32.totalorder %s44_s23, 0  ;;  %s187_s1 = sor.u32 %s2062_s7, %s44_s23 }
  0x44   : > { %2571 = sst [smem:[#allocation32_spill]] %s2570_s21  ;;  %p2081_p6 = scmp.eq.s32.totalorder %s187_s1, 0 }
  0x45   : > { %p2088_p11 = por %p227_p0, %p54_p3  ;;  %p2098_p10 = por %p233_p2, %p60_p9 }
  0x46   : > { %s2573_s11 = scalar_select %p2081_p6, 1, 0 }
  0x47   : > { %s2575_s21 = scalar_select %p2088_p11, 1, 0 }
  0x48   : > { %2574 = sst [smem:[#allocation34_spill]] %s2573_s11  ;;  %s2536_s22 = sand.u32 1, %s1871_s14  }
  0x49   : > { %2576 = sst [smem:[#allocation35_spill]] %s2575_s21  ;;  %s288_s6 = sand.u32 1, %s1851_s9  }
  0x4a   : > { %s2093_s16 = scalar_select %p45_p1, %s1851_s9, %s47_s20  }
  0x4b   : > { %s2578_s10 = scalar_select %p2098_p10, 1, 0 }
  0x4c   : > { %2577 = sst [smem:[#allocation36_spill]] %s2093_s16  ;;  %s1183_s24 = sshll.u32 %s288_s6, 3 }
  0x4d   : > { %2579 = sst [smem:[#allocation37_spill]] %s2578_s10  ;;  %s1184_s23 = sshll.u32 %s1867_s13, 7 }
  0x4e   : > { %s2580_s0 = sld [smem:[#allocation40_spill]]  ;;  %s290_s20 = scalar_lea.vmem [#allocation4], %s1183_s24 }
  0x4f   : > { %s297_s16 = sshll.u32 %s290_s20, 4  ;;  %p2114_p3 = pnand %p2533_p4, %p2054_p8  ;;  %s2118_s16 = int_to_ptr.vmem [resolvable:$true] %s297_s16 }
  0x50   : > { %s2122_s6 = scalar_lea.sflag [#allocation5], %s2536_s22 }
  0x51   : > { %p1535_p0 = pneg %p2114_p3 }
  0x54   : > { %s2108_s11 = scalar_lea.hbm %s2580_s0, %s1184_s23  ;;  %s1538_s23 = scalar_lea.hbm %s2580_s0, 256 }
  0x55   : > { %s1533_s25 = scalar_lea.hbm %s2108_s11, 128  ;;  %p1539_p8 = scmp.lt.u32.totalorder %s2108_s11, %s2580_s0 }
  0x56   : > { %p1534_p9 = scmp.ne.s32.totalorder %s2108_s11, %s1533_s25  ;;  %p1540_p4 = scmp.lt.u32.totalorder %s1538_s23, %s1533_s25 }
  0x57   : > { %p1542_p10 = scmp.lt.u32.totalorder %s1533_s25, %s2108_s11 }
  0x58   : > { %p1536_p2 = pnand %p1535_p0, %p1534_p9  ;;  %p1541_p13 = por %p1540_p4, %p1539_p8 }
  0x5a   : > { %p1537_p1 = pneg %p1536_p2  ;;  %p1543_p11 = por %p1542_p10, %p1541_p13 }
  0x5c   : > { %p1544_p12 = pnand %p1543_p11, %p1537_p1 }
  0x5e   : > { %1547 = shalt.err (!%p1544_p12)
}
  0x5f   : > { %s1548_s22 = scalar_lea.vmem %s2118_s16, 128  ;;  %s1874_s24 = smov [#allocation4]  }
  0x60   : > { %p1549_p9 = scmp.ne.s32.totalorder %s2118_s16, %s1548_s22  ;;  %s1553_s18 = sshll.u32 %s1874_s24, 4  ;;  %s1554_s18 = int_to_ptr.vmem [resolvable:$false] %s1553_s18 }
  0x61   : > { %s1555_s1 = scalar_lea.vmem %s1554_s18, 256  ;;  %p1556_p5 = scmp.lt.s32.totalorder %s2118_s16, %s1554_s18 }
  0x62   : > { %p1551_p2 = pnand %p1549_p9, %p1535_p0  ;;  %p1557_p4 = scmp.lt.s32.totalorder %s1555_s1, %s1548_s22 }
  0x64   : > { %p1552_p6 = pneg %p1551_p2  ;;  %p1558_p8 = por %p1557_p4, %p1556_p5 }
  0x66   : > { %p1559_p13 = pnand %p1558_p8, %p1552_p6 }
  0x68   : > { %1562 = shalt.err (!%p1559_p13)
}
  0x69   : > { %1356 = dma.hbm_to_vmem [thread:$0]  (!%p2114_p3), %s2108_s11, 128, %s2118_s16, %s2122_s6  }
  0x6a   : > { %s115_s22 = sadd.s32 1, %s1839_s29  ;;  %p2582_p5 = scmp.eq.s32.totalorder %s2062_s7, 0 }
  0x6b   : > { %p122_p6 = scmp.ne.s32.totalorder %s1839_s29, %s1835_s28  ;;  %p128_p12 = scmp.ne.s32.totalorder %s1835_s28, %s1831_s27 }
  0x6c   : > { %s2154_s30 = scalar_select %p2582_p5, %s1839_s29, %s115_s22  }
  0x6d   : > { %s306_s25 = sand.u32 1, %s1839_s29   ;;  %s1319_s23 = smul.u32 1536, %s1863_s12 }
  0x6e   : > { %2583 = sst [smem:[#allocation38_spill]] %s2154_s30  ;;  %p2584_p11 = scmp.eq.s32.totalorder %s1871_s14, 0 }
  0x6f   : > { %p2585_p0 = scmp.eq.s32.totalorder %s1998_s15, 0  ;;  %s1318_s24 = smul.u32 96, %s306_s25 }
  0x70   : > { %p124_p10 = por %p122_p6, %p2584_p11  ;;  %s2588_s3 = sld [smem:[#allocation42_spill]] }
  0x71   : > { %p2166_p1 = por %p128_p12, %p2585_p0  ;;  %p2589_p3 = scmp.lt.s32.totalorder %s1871_s14, 4 }
  0x72   : > { %s308_s11 = scalar_lea.vmem [#allocation10], %s1318_s24  ;;  %s2183_s22 = sshll.u32 %s306_s25, 4 }
  0x73   : > { %s2586_s20 = scalar_select %p2166_p1, 1, 0 }
  0x74   : > { %p2177_p9 = pnand %p2589_p3, %p124_p10  ;;  %s315_s7 = sshll.u32 %s308_s11, 4  ;;  %s2181_s7 = int_to_ptr.vmem [resolvable:$true] %s315_s7 }
  0x75   : > { %2587 = sst [smem:[#allocation39_spill]] %s2586_s20  ;;  %s2591_s18 = sand.u32 1, %s1871_s14  }
  0x76   : > { %s2173_s16 = scalar_lea.hbm %s2588_s3, %s1319_s23  ;;  %s2187_s23 = scalar_lea.sflag [#allocation11], %s2591_s18 }
  0x77   : > { %s2590_s27 = scalar_select %p2177_p9, 1, 0 }
  0x78   : > { %s1563_s1 = scalar_lea.hbm %s2173_s16, 1536  ;;  %p2547_p4 = pneg %p2177_p9 }
  0x79   : > { %p1564_p2 = scmp.ne.s32.totalorder %s2173_s16, %s1563_s1  ;;  %s1568_s24 = scalar_lea.hbm %s2588_s3, 3072 }
  0x7a   : > { %p1569_p5 = scmp.lt.u32.totalorder %s2173_s16, %s2588_s3  ;;  %p1570_p6 = scmp.lt.u32.totalorder %s1568_s24, %s1563_s1 }
  0x7b   : > { %p1566_p8 = pnand %p2547_p4, %p1564_p2  ;;  %p1572_p11 = scmp.lt.u32.totalorder %s1563_s1, %s2173_s16 }
  0x7c   : > { %p1571_p12 = por %p1570_p6, %p1569_p5 }
  0x7d   : > { %p1567_p13 = pneg %p1566_p8 }
  0x7e   : > { %p1573_p10 = por %p1572_p11, %p1571_p12 }
  0x80   : > { %p1574_p0 = pnand %p1573_p10, %p1567_p13 }
  0x82   : > { %1577 = shalt.err (!%p1574_p0)
}
  0x83   : > { %s1578_s25 = scalar_lea.vmem %s2181_s7, 1536  ;;  %s1875_s0 = smov [#allocation10]  }
  0x84   : > { %p1579_p3 = scmp.ne.s32.totalorder %s2181_s7, %s1578_s25  ;;  %s1583_s9 = sshll.u32 %s1875_s0, 4  ;;  %s1584_s9 = int_to_ptr.vmem [resolvable:$false] %s1583_s9 }
  0x85   : > { %s1585_s30 = scalar_lea.vmem %s1584_s9, 3072  ;;  %p1586_p1 = scmp.lt.s32.totalorder %s2181_s7, %s1584_s9 }
  0x86   : > { %p1581_p2 = pnand %p1579_p3, %p2547_p4  ;;  %p1587_p5 = scmp.lt.s32.totalorder %s1585_s30, %s1578_s25 }
  0x88   : > { %p1582_p8 = pneg %p1581_p2  ;;  %p1588_p6 = por %p1587_p5, %p1586_p1 }
  0x8a   : > { %p1589_p12 = pnand %p1588_p6, %p1582_p8 }
  0x8c   : > { %1592 = shalt.err (!%p1589_p12)
}
  0x8d   : > { %s1876_s18 = smov 128   ;;  %s1877_s1 = smov 8  }
  0x8e   : > { %1359 = dma.hbm_to_vmem [thread:$0]  (!%p2177_p9), %s2173_s16, 1536, %s2181_s7, %s2187_s23, %s1876_s18, %s1876_s18, %s1877_s1  }
  0x8f   : > { %s1878_s24 = smov [#allocation9]   ;;  %s1879_s0 = smov [#allocation13]  }
  0x90   : > { %s264_s11 = sshll.u32 %s1878_s24, 4  ;;  %s275_s25 = sshll.u32 %s1879_s0, 4  ;;  %s265_s11 = int_to_ptr.vmem [resolvable:$true] %s264_s11  ;;  %s276_s25 = int_to_ptr.vmem [resolvable:$true] %s275_s25 }
  0x91   : > { %s1593_s3 = scalar_lea.hbm %s2514_s2, 16 }
  0x92   : > { %p1594_p1 = scmp.ne.s32.totalorder %s2514_s2, %s1593_s3  ;;  %p1600_p10 = scmp.lt.u32.totalorder %s1593_s3, %s2514_s2 }
  0x94   : > { %p1596_p13 = pnand %p1594_p1, %p2023_p7 }
  0x96   : > { %p1597_p11 = pneg %p1596_p13 }
  0x98   : > { %p1602_p0 = pnand %p1600_p10, %p1597_p11 }
  0x9a   : > { %1605 = shalt.err (!%p1602_p0)
}
  0x9b   : > { %s1606_s16 = scalar_lea.vmem %s265_s11, 16  ;;  %s1613_s7 = scalar_lea.vmem %s265_s11, 32 }
  0x9c   : > { %p1607_p3 = scmp.ne.s32.totalorder %s265_s11, %s1606_s16  ;;  %p1614_p5 = scmp.lt.s32.totalorder %s265_s11, %s265_s11 }
  0x9d   : > { %p1615_p6 = scmp.lt.s32.totalorder %s1613_s7, %s1606_s16 }
  0x9e   : > { %p1609_p2 = pnand %p1607_p3, %p2023_p7 }
  0x9f   : > { %p1616_p12 = por %p1615_p6, %p1614_p5 }
  0xa0   : > { %p1610_p8 = pneg %p1609_p2 }
  0xa2   : > { %p1617_p4 = pnand %p1616_p12, %p1610_p8 }
  0xa4   : > { %1620 = shalt.err (!%p1617_p4)
}
  0xa5   : > { %p2592_p1 = scmp.ne.s32.totalorder %s2564_s19, 0  ;;  %s1224_s3 = sshll.u32 %s1863_s12, 8 }
  0xa6   : > { %s1621_s24 = scalar_lea.hbm %s2517_s5, 16 }
  0xa7   : > { %1349 = dma.hbm_to_vmem [thread:$0]  (!%p2592_p1), %s2514_s2, 16, %s265_s11, [#allocation8]  }
  0xa8   : > { %p1622_p13 = scmp.ne.s32.totalorder %s2517_s5, %s1621_s24  ;;  %p1628_p10 = scmp.lt.u32.totalorder %s1621_s24, %s2517_s5 }
  0xaa   : > { %p1624_p4 = pnand %p1622_p13, %p2023_p7 }
  0xac   : > { %p1625_p11 = pneg %p1624_p4 }
  0xae   : > { %p1630_p0 = pnand %p1628_p10, %p1625_p11 }
  0xb0   : > { %1633 = shalt.err (!%p1630_p0)
}
  0xb1   : > { %s1634_s11 = scalar_lea.vmem %s276_s25, 16  ;;  %s1641_s7 = scalar_lea.vmem %s276_s25, 32 }
  0xb2   : > { %p1635_p3 = scmp.ne.s32.totalorder %s276_s25, %s1634_s11  ;;  %p1642_p5 = scmp.lt.s32.totalorder %s276_s25, %s276_s25 }
  0xb3   : > { %p1643_p6 = scmp.lt.s32.totalorder %s1641_s7, %s1634_s11 }
  0xb4   : > { %p1637_p2 = pnand %p1635_p3, %p2023_p7 }
  0xb5   : > { %p1644_p12 = por %p1643_p6, %p1642_p5 }
  0xb6   : > { %p1638_p8 = pneg %p1637_p2 }
  0xb8   : > { %p1645_p9 = pnand %p1644_p12, %p1638_p8 }
  0xba   : > { %1648 = shalt.err (!%p1645_p9)
}
  0xbb   : > { %1352 = dma.hbm_to_vmem [thread:$0]  (!%p2592_p1), %s2517_s5, 16, %s276_s25, [#allocation14]  }
  0xbc   : > { %s2258_s17 = scalar_lea.hbm %s2516_s4, %s1224_s3  ;;  %s329_s24 = scalar_lea.vmem [#allocation12], %s2183_s22 }
  0xbd   : > { %s336_s0 = sshll.u32 %s329_s24, 4  ;;  %s1649_s19 = scalar_lea.hbm %s2258_s17, 256  ;;  %s2261_s0 = int_to_ptr.vmem [resolvable:$true] %s336_s0 }
  0xbe   : > { %p1650_p7 = scmp.ne.s32.totalorder %s2258_s17, %s1649_s19  ;;  %p2593_p9 = scmp.ne.s32.totalorder %s2590_s27, 0 }
  0xbf   : > { %s1654_s30 = scalar_lea.hbm %s2516_s4, 512  ;;  %p1655_p1 = scmp.lt.u32.totalorder %s2258_s17, %s2516_s4 }
  0xc0   : > { %p2594_p13 = pneg %p2593_p9  ;;  %p1656_p10 = scmp.lt.u32.totalorder %s1654_s30, %s1649_s19 }
  0xc1   : > { %p1658_p3 = scmp.lt.u32.totalorder %s1649_s19, %s2258_s17 }
  0xc2   : > { %p1652_p4 = pnand %p1650_p7, %p2594_p13  ;;  %p1657_p0 = por %p1656_p10, %p1655_p1 }
  0xc4   : > { %p1653_p11 = pneg %p1652_p4  ;;  %p1659_p2 = por %p1658_p3, %p1657_p0 }
  0xc6   : > { %p1660_p8 = pnand %p1659_p2, %p1653_p11 }
  0xc8   : > { %1663 = shalt.err (!%p1660_p8)
}
  0xc9   : > { %s1664_s22 = scalar_lea.vmem %s2261_s0, 256  ;;  %p2595_p6 = pmov %p2594_p13 }
  0xca   : > { %p1665_p5 = scmp.ne.s32.totalorder %s2261_s0, %s1664_s22  ;;  %s1880_s11 = smov [#allocation12]  }
  0xcb   : > { %s1669_s7 = sshll.u32 %s1880_s11, 4  ;;  %s1670_s7 = int_to_ptr.vmem [resolvable:$false] %s1669_s7 }
  0xcc   : > { %p1667_p12 = pnand %p1665_p5, %p2595_p6  ;;  %s1671_s29 = scalar_lea.vmem %s1670_s7, 512 }
  0xcd   : > { %p1672_p13 = scmp.lt.s32.totalorder %s2261_s0, %s1670_s7  ;;  %p1673_p4 = scmp.lt.s32.totalorder %s1671_s29, %s1664_s22 }
  0xce   : > { %p1668_p7 = pneg %p1667_p12 }
  0xcf   : > { %p1674_p1 = por %p1673_p4, %p1672_p13 }
  0xd1   : > { %p1675_p10 = pnand %p1674_p1, %p1668_p7 }
  0xd3   : > { %1678 = shalt.err (!%p1675_p10)
}
  0xd4   : > { %s2596_s10 = sld [smem:[#allocation34_spill]]  ;;  %s2597_s21 = sld [smem:[#allocation24_spill]] }
  0xd5   : > { %s2598_s20 = sld [smem:[#allocation23_spill]]  ;;  %s190_s27 = sadd.s32 1, %s1827_s26 }
  0xd6   : > { %1362 = dma.hbm_to_vmem [thread:$0]  (!%p2593_p9), %s2258_s17, 256, %s2261_s0, %s2187_s23, %s1876_s18, %s1876_s18, %s1877_s1  }
  0xd7   : > { %s348_s19 = sand.u32 1, %s1827_s26   ;;  %s1190_s25 = sshll.u32 %s1867_s13, 1 }
  0xd8   : > { %p2600_p2 = scmp.eq.s32.totalorder %s1871_s14, 0  ;;  %p2601_p5 = scmp.eq.s32.totalorder %s1998_s15, 0 }
  0xd9   : > { %s1189_s30 = sshll.u32 %s348_s19, 1  ;;  %s355_s3 = sadd.s32 %s1863_s12, %s1190_s25 }
  0xda   : > { %p2599_p11 = scmp.ne.s32.totalorder %s2596_s10, 0  ;;  %p197_p0 = scmp.ne.s32.totalorder %s1827_s26, %s2597_s21 }
  0xdb   : > { %p203_p3 = scmp.ne.s32.totalorder %s2597_s21, %s2598_s20  ;;  %s1191_s16 = sshll.u32 %s355_s3, 5 }
  0xdc   : > { %s2294_s24 = scalar_select %p2599_p11, %s1827_s26, %s190_s27  }
  0xdd   : > { %p199_p8 = por %p197_p0, %p2600_p2  ;;  %p2306_p6 = por %p203_p3, %p2601_p5 }
  0xde   : > { %s2603_s1 = sld [smem:[#allocation43_spill]]  ;;  %s350_s0 = scalar_lea.vmem [#allocation15], %s1189_s30 }
  0xdf   : > { %s359_s22 = sshll.u32 %s350_s0, 4  ;;  %p2604_p9 = scmp.lt.s32.totalorder %s1871_s14, 4  ;;  %s2316_s22 = int_to_ptr.vmem [resolvable:$true] %s359_s22 }
  0xe1   : > { %p2320_p12 = pnand %p2604_p9, %p199_p8 }
  0xe3   : > { %p1681_p13 = pneg %p2320_p12 }
  0xe4   : > { %s2314_s17 = scalar_lea.hbm %s2603_s1, %s1191_s16  ;;  %s1684_s21 = scalar_lea.hbm %s2603_s1, 128 }
  0xe5   : > { %s1679_s7 = scalar_lea.hbm %s2314_s17, 32  ;;  %p1685_p10 = scmp.lt.u32.totalorder %s2314_s17, %s2603_s1 }
  0xe6   : > { %p1680_p7 = scmp.ne.s32.totalorder %s2314_s17, %s1679_s7  ;;  %p1686_p11 = scmp.lt.u32.totalorder %s1684_s21, %s1679_s7 }
  0xe7   : > { %p1688_p3 = scmp.lt.u32.totalorder %s1679_s7, %s2314_s17 }
  0xe8   : > { %p1682_p4 = pnand %p1681_p13, %p1680_p7  ;;  %p1687_p0 = por %p1686_p11, %p1685_p10 }
  0xea   : > { %p1683_p1 = pneg %p1682_p4  ;;  %p1689_p2 = por %p1688_p3, %p1687_p0 }
  0xec   : > { %p1690_p8 = pnand %p1689_p2, %p1683_p1 }
  0xee   : > { %1693 = shalt.err (!%p1690_p8)
}
  0xef   : > { %s1694_s19 = scalar_lea.vmem %s2316_s22, 32  ;;  %s1881_s25 = smov [#allocation15]  }
  0xf0   : > { %p1695_p5 = scmp.ne.s32.totalorder %s2316_s22, %s1694_s19  ;;  %s1699_s30 = sshll.u32 %s1881_s25, 4  ;;  %s1700_s30 = int_to_ptr.vmem [resolvable:$false] %s1699_s30 }
  0xf1   : > { %s1701_s3 = scalar_lea.vmem %s1700_s30, 64  ;;  %p1702_p4 = scmp.lt.s32.totalorder %s2316_s22, %s1700_s30 }
  0xf2   : > { %p1697_p9 = pnand %p1695_p5, %p1681_p13  ;;  %p1703_p10 = scmp.lt.s32.totalorder %s1701_s3, %s1694_s19 }
  0xf4   : > { %p1698_p7 = pneg %p1697_p9  ;;  %p1704_p11 = por %p1703_p10, %p1702_p4 }
  0xf6   : > { %p1705_p0 = pnand %p1704_p11, %p1698_p7 }
  0xf8   : > { %1708 = shalt.err (!%p1705_p0)
}
  0xf9   : > { %1365 = dma.hbm_to_vmem [thread:$0]  (!%p2320_p12), %s2314_s17, 32, %s2316_s22, %s2122_s6  }
  0xfa   : > { %s2606_s16 = sld [smem:[#allocation30_spill]] }
 0x100   : > { %p2607_p1 = scmp.ne.s32.totalorder %s2606_s16, 0 }
 0x101   : > { %s2608_s23 = sld [smem:[#allocation32_spill]] (!%p2607_p1)  ;;  %s370_s18 = sand.u32 (!%p2607_p1), 1, %s1998_s15  }
 0x102   : > { %368 = sbr.rel (%p2607_p1) target bundleno = 1827 (0x723), region = 48  ;;  %s372_s0 = sand.u32 (!%p2607_p1), 1, %s1847_s8  }
 0x103   : > { %s2356_s7 = sshll.u32 (!%p2607_p1), %s372_s0, 3  ;;  %s371_s29 = scalar_lea.sflag (!%p2607_p1), [#allocation5], %s370_s18 }
 0x104   : > { %s374_s10 = scalar_lea.vmem (!%p2607_p1), [#allocation4], %s2356_s7 }
 0x107   : > { %p2609_p13 = scmp.ne.s32.totalorder (!%p2607_p1), %s2608_s23, 0 }
 0x109   : > { %1794 = dma.done.wait (%p2609_p13), %s371_s29, 128  }
 0x10a   : > { %1796 = vsyncadd (%p2609_p13), %s371_s29, 4294967168  ;;  %p2610_p12 = scmp.eq.s32.totalorder %s1998_s15, 0 }
 0x10c   : > { %1798 = dma.done.wait (%p2610_p12), [#allocation8], 32   ;;  %p2611_p3 = pmov %p2610_p12 }
 0x10d   : > { %s2612_s6 = sld [smem:[#allocation39_spill]]  ;;  %s389_s17 = sand.u32 1, %s1835_s28  }
 0x10e   : > { %1800 = vsyncadd (%p2611_p3), [#allocation8], 4294967264  ;;  %s1320_s22 = smul.u32 96, %s389_s17  ;;  %s388_s11 = scalar_lea.sflag [#allocation11], %s370_s18 }
 0x110   : > { %s2368_s21 = scalar_lea.vmem [#allocation10], %s1320_s22 }
 0x113   : > { %p2613_p2 = scmp.ne.s32.totalorder %s2612_s6, 0 }
 0x115   : > { %1802 = dma.done.wait (%p2613_p2), %s388_s11, 1792  }
 0x116   : > { %1804 = vsyncadd (%p2613_p2), %s388_s11, 4294965504  ;;  %s2374_s20 = sshll.u32 %s389_s17, 4  ;;  %p2614_p8 = pmov %p2611_p3 }
 0x117   : > { %s400_s27 = scalar_lea.vmem [#allocation12], %s2374_s20 }
 0x118   : > { %1806 = dma.done.wait (%p2614_p8), [#allocation14], 16   ;;  %p2615_p5 = pmov %p2611_p3 }
 0x119   : > { %s2616_s19 = sld [smem:[#allocation24_spill]] }
 0x11a   : > { %1808 = vsyncadd (%p2615_p5), [#allocation14], 4294967280 }
 0x11f   : > { %s411_s25 = sand.u32 1, %s2616_s19  }
 0x120   : > { %s2382_s30 = sshll.u32 %s411_s25, 1 }
 0x121   : > { %s413_s3 = scalar_lea.vmem [#allocation15], %s2382_s30 }
 0x122   : > { %1810 = dma.done.wait (%p2306_p6), %s371_s29, 32  }
 0x123   : > { %1812 = vsyncadd (%p2306_p6), %s371_s29, 4294967264  ;;  %s458_s16 = scalar_lea.vmem [#allocation16], %s2356_s7  ;;  %s2617_s23 = sld [smem:[#allocation28_spill]] }
 0x129   : > { %p1200_p9 = scmp.ne.s32.totalorder %s2617_s23, 0 }
 0x12a   : > { %v465_v0 = vld [vmem:[%s374_s10] sm:$0xff] (!%p1200_p9)  ;;  %vm466_vm0 = vcmask (!%p1200_p9), 261120   ;;  %v1203_v1 = vld [vmem:[#allocation13] ss:$0 sm:$0xff] (!%p1200_p9)  ;;  %v1201_v12 = vld [vmem:[#allocation7] ss:$0 sm:$0xff] (!%p1200_p9) }
 0x12b   : > { %464 = sbr.rel (%p1200_p9) target bundleno = 613 (0x265), region = 80  ;;  %v467_v2 = vsel (!%p1200_p9), %vm466_vm0, %v465_v0, 0.0  ;;  %505 = vst.msk [vmem:[#allocation3] sm:$0xff] (!%p1200_p9), %vm466_vm0, %v1203_v1  ;;  %v1202_v14 = vld [vmem:[#allocation9] ss:$0 sm:$0xff] (!%p1200_p9) }
 0x12c   : > { %468 = vadd.xlane.f32.xlu0 (!%p1200_p9), %v467_v2 }
 0x1b9   : > { %v469_v3 = vpop.xlane.xlu0 %468 }
 0x1ba   : > { %v471_v4 = vmul.f32 0.03125, %v469_v3 }
 0x1bc   : > { %v472_v5 = vsub.f32 %v465_v0, %v471_v4 }
 0x1be   : > { %v473_v6 = vmul.f32 %v472_v5, %v472_v5 }
 0x1c0   : > { %v474_v7 = vsel %vm466_vm0, %v473_v6, 0.0 }
 0x1c1   : > { %475 = vadd.xlane.f32.xlu0 %v474_v7 }
 0x24e   : > { %v476_v8 = vpop.xlane.xlu0 %475 }
 0x24f   : > { %v477_v9 = vmul.f32 0.03125, %v476_v8 }
 0x251   : > { %v478_v10 = vadd.f32 1e-05, %v477_v9 }
 0x253   : > { %1499 = vrsqrt.f32 %v478_v10 }
 0x25d   : > { %v1500_v11 = vpop.eup %1499 }
 0x25e   : > { %v480_v13 = vmul.f32 %v1500_v11, %v472_v5 }
 0x260   : > { %v488_v15 = vmul.f32 %v1201_v12, %v480_v13 }
 0x262   : > { %v496_v16 = vadd.f32 %v1202_v14, %v488_v15 }
 0x264   : > { %497 = vst.msk [vmem:[#allocation2] sm:$0xff] %vm466_vm0, %v496_v16 }
 0x265 PF: > { %v1205_v17 = vld [vmem:[%s2368_s21 + $0x20] sm:$0xff]  ;;  %v1206_v18 = vld [vmem:[%s2368_s21 + $0x28] sm:$0xff]  ;;  %v1882_v20 = vmov 0.0|0.0   ;;  %v1207_v23 = vld [vmem:[%s2368_s21 + $0x30] sm:$0xff]  ;;  %vm1883_vm1 = vmmov 0   ;;  %v1884_v26 = vmov 0.0  }
 0x266   : > { %v507_v19 = vld [vmem:[%s2368_s21] sm:$0xff]  ;;  %1303 = vmatprep.subr.bf16.mxu1 %v1882_v20  ;;  %v1304_v21 = vpack.c.bf16 %v1206_v18, %v1205_v17  ;;  %1297 = vmatprep.subr.bf16.mxu0 %v1882_v20  ;;  %v508_v22 = vld [vmem:[%s2368_s21 + $0x8] sm:$0xff]  ;;  %v1208_v24 = vld [vmem:[%s2368_s21 + $0x38] sm:$0xff]  ;;  %vm511_vm2 = vcmask 261120   ;;  %vm735_vm3 = vcmask 130048   ;;  %v1885_v43 = vmov 0  }
 0x267   : > { %v1298_v25 = vpack.c.bf16 %v508_v22, %v507_v19  ;;  %1266 = vmatprep.mubr.msk.f32.mxu1 %vm1883_vm1, %v1884_v26  ;;  %v509_v27 = vld [vmem:[%s2368_s21 + $0x10] sm:$0xff]  ;;  %v510_v28 = vld [vmem:[%s2368_s21 + $0x18] sm:$0xff]  ;;  %1255 = vmatprep.mubr.msk.f32.mxu0 %vm1883_vm1, %v1884_v26  ;;  %v1307_v29 = vpack.c.bf16 %v1208_v24, %v1207_v23  ;;  %v1210_v36 = vld [vmem:[%s2368_s21 + $0x40] sm:$0xff]  ;;  %vm818_vm6 = vcmask 64512   ;;  %s2618_s15 = sld [smem:[#allocation28_spill]] }
 0x268   : > { %1305 = vmatpush3.bf16.msra.mxu1 %v1304_v21  ;;  %v1301_v30 = vpack.c.bf16 %v510_v28, %v509_v27  ;;  %v1211_v37 = vld [vmem:[%s2368_s21 + $0x48] sm:$0xff]  ;;  %v1212_v38 = vld [vmem:[%s2368_s21 + $0x50] sm:$0xff]  ;;  %v1213_v40 = vld [vmem:[%s2368_s21 + $0x58] sm:$0xff] }
 0x269   : > { %1299 = vmatpush3.bf16.msra.mxu0 %v1298_v25  ;;  %1306 = vmatprep.subr.bf16.mxu1 %v1882_v20  ;;  %v1310_v39 = vpack.c.bf16 %v1211_v37, %v1210_v36  ;;  %v1313_v41 = vpack.c.bf16 %v1213_v40, %v1212_v38  ;;  %v812_v42 = vld [vmem:[%s413_s3] sm:$0x3]  ;;  %v905_v58 = vld [vmem:[%s400_s27 + $0x8] sm:$0xff] }
 0x26a   : > { %1300 = vmatprep.subr.bf16.mxu0 %v1882_v20  ;;  %vm813_vm4 = vnez %v812_v42  ;;  %v904_v57 = vld [vmem:[%s400_s27] sm:$0xff] }
 0x26b   : > { %v506_v31 = vld [vmem:[#allocation2] sm:$0xff]  ;;  %v814_v44 = vsel %vm813_vm4, 16843009, %v1885_v43  ;;  %v1316_v59 = vpack.c.bf16 %v905_v58, %v904_v57  ;;  %v903_v1 = vld [vmem:[#allocation3] sm:$0xff] }
 0x26c   : > { %1308 = vmatpush3.bf16.msra.mxu1 %v1307_v29  ;;  %v815_v45 = vunpack.c.0.s8 %v814_v44 }
 0x26d   : > { %1302 = vmatpush3.bf16.msra.mxu0 %v1301_v30  ;;  %1280 = vmatprep.subr.mxu1 %v1884_v26  ;;  %p1219_p6 = scmp.ne.s32.totalorder %s2618_s15, 1 }
 0x26e   : > { %1309 = vmatprep.subr.bf16.mxu0 %v1882_v20  ;;  %vm816_vm5 = vcmp.ne.s32.totalorder %v815_v45, 0 }
 0x26f   : > { %1267 = vmatmul.mubr.msk.f32.vlgmr.msra.gmra.mrb[0].mxu1 %vm511_vm2, %v506_v31 }
 0x270   : > { %1256 = vmatmul.mubr.msk.f32.vlgmr.msra.gmra.mrb[0].mxu0 %vm511_vm2, %v506_v31  ;;  %1282 = vmatprep.mubr.msk.f32.mxu1 %vm1883_vm1, %v1884_v26 }
 0x271   : > { %1277 = vmatprep.mubr.msk.f32.mxu0 %vm1883_vm1, %v1884_v26  ;;  %1311 = vmatpush3.bf16.msra.mxu0 %v1310_v39 }
 0x272   : > { %1312 = vmatprep.subr.bf16.mxu0 %v1882_v20 }
 0x275   : > { %1314 = vmatpush3.bf16.msra.mxu0 %v1313_v41 }
 0x276   : > { %1315 = vmatprep.subr.bf16.mxu0 %v1882_v20 }
 0x278   : > { %1278 = vmatmul.mubr.msk.f32.vlgmr.msra.gmra.mrb[2].mxu0 %vm511_vm2, %v506_v31 }
 0x279   : > { %1294 = vmatprep.mubr.msk.f32.mxu0 %vm1883_vm1, %v1884_v26  ;;  %1317 = vmatpush3.bf16.msra.mxu0 %v1316_v59 }
 0x342   : > { %v656_v32 = vpop.f32.mrb[0].mxu1 }
 0x343   : > { %v1268_v33 = vpop.f32.mrb[1].mxu1  ;;  %1281 = vmatpush3.xpose.msk.msra.mxu1 %vm735_vm3, %v656_v32  ;;  %v581_v34 = vpop.f32.mrb[0].mxu0 }
 0x344   : > { %v1257_v35 = vpop.f32.mrb[1].mxu0  ;;  %1285 = vmatprep.subr.mxu1 %v1884_v26 }
 0x346   : > { %1283 = vmatmul.mubr.msk.f32.vlgmr.msra.gmra.mrb[2].mxu1 %vm735_vm3, %v581_v34 }
 0x347   : > { %1287 = vmatprep.mubr.msk.f32.mxu1 %vm1883_vm1, %v1884_v26 }
 0x34b   : > { %v731_v55 = vpop.f32.mrb[2].mxu0 }
 0x34c   : > { %v1279_v56 = vpop.f32.mrb[3].mxu0  ;;  %1286 = vmatpush3.msra.mxu1 %v731_v55 }
 0x419   : > { %v808_v46 = vpop.f32.mrb[2].mxu1 }
 0x41a   : > { %v817_v47 = vsel %vm816_vm5, -1e+12, %v808_v46  ;;  %v1284_v48 = vpop.f32.mrb[3].mxu1 }
 0x41b   : > { %v819_v49 = vsel %vm818_vm6, %v817_v47, -inf }
 0x41c   : > { %820 = vmax.xlane.f32.xlu0 %v819_v49 }
 0x4a9   : > { %v821_v50 = vpop.xlane.xlu0 %820 }
 0x4aa   : > { %v822_v51 = vsub.f32 %v817_v47, %v821_v50 }
 0x4ac   : > { %v823_v52 = vmul.f32 1.442695, %v822_v51 }
 0x4ae   : > { %1501 = vpow2.f32 %v823_v52 }
 0x4b8   : > { %v1502_v53 = vpop.eup %1501 }
 0x4b9   : > { %v825_v54 = vsel %vm818_vm6, %v1502_v53, 0.0 }
 0x4ba   : > { %826 = vadd.xlane.f32.xlu0 %v825_v54 }
 0x547   : > { %v827_v60 = vpop.xlane.xlu0 %826 }
 0x548   : > { %1503 = vrcp.f32 %v827_v60 }
 0x552   : > { %v1504_v61 = vpop.eup %1503 }
 0x553   : > { %v829_v62 = vmul.f32 %v1504_v61, %v1502_v53 }
 0x555   : > { %1288 = vmatmul.mubr.msk.f32.vlgmr.msra.gmra.mrb[4].mxu1 %vm818_vm6, %v829_v62 }
 0x628   : > { %v899_v63 = vpop.f32.mrb[4].mxu1 }
 0x629   : > { %v1289_v0 = vpop.f32.mrb[5].mxu1  ;;  %1295 = vmatmul.mubr.msk.f32.vlgmr.msra.gmra.mrb[4].mxu0 %vm735_vm3, %v899_v63 }
 0x6f9   : > { %984 = sbr.rel (%p1219_p6) target bundleno = 1800 (0x708), region = 84 }
 0x6fc   : > { %v975_v2 = vpop.f32.mrb[4].mxu0 }
 0x6fd   : > { %v979_v3 = vadd.f32 %v975_v2, %v903_v1  ;;  %v1296_v4 = vpop.f32.mrb[5].mxu0 }
 0x6ff   : > { %980 = vst.msk [vmem:[#allocation3] sm:$0xff] %vm511_vm2, %v979_v3 }
 0x706   : > { %v985_v5 = vld [vmem:[#allocation3] sm:$0xff] }
 0x707   : > { %986 = vst.msk [vmem:[%s458_s16] sm:$0xff] %vm511_vm2, %v985_v5 }
 0x708 PF: > { %s2619_s9 = sld [smem:[#allocation29_spill]]  ;;  %s2620_s18 = sld [smem:[#allocation35_spill]] }
 0x709   : > { %s2621_s17 = sld [smem:[#allocation44_spill]]  ;;  %s1001_s11 = sshll.u32 %s458_s16, 4  ;;  %s1002_s11 = int_to_ptr.vmem [resolvable:$true] %s1001_s11 }
 0x70a   : > { %s988_s21 = scalar_lea.sflag [#allocation6], %s372_s0  ;;  %s1709_s20 = scalar_lea.vmem %s1002_s11, 128 }
 0x70b   : > { %p1710_p7 = scmp.ne.s32.totalorder %s1002_s11, %s1709_s20  ;;  %s1886_s27 = smov [#allocation16]  }
 0x70c   : > { %s1713_s19 = sshll.u32 %s1886_s27, 4  ;;  %s1714_s19 = int_to_ptr.vmem [resolvable:$false] %s1713_s19 }
 0x70d   : > { %s1715_s25 = scalar_lea.vmem %s1714_s19, 256  ;;  %p1716_p0 = scmp.lt.s32.totalorder %s1002_s11, %s1714_s19 }
 0x70e   : > { %s1221_s29 = sshll.u32 %s2619_s9, 7  ;;  %p2622_p4 = scmp.ne.s32.totalorder %s2620_s18, 0 }
 0x70f   : > { %s2437_s22 = scalar_lea.hbm %s2621_s17, %s1221_s29  ;;  %p1717_p1 = scmp.lt.s32.totalorder %s1715_s25, %s1709_s20 }
 0x710   : > { %p1711_p10 = pnand %p1710_p7, %p2622_p4 }
 0x711   : > { %p1718_p13 = por %p1717_p1, %p1716_p0 }
 0x712   : > { %p1712_p11 = pneg %p1711_p10 }
 0x714   : > { %p1719_p12 = pnand %p1718_p13, %p1712_p11 }
 0x716   : > { %1722 = shalt.err (!%p1719_p12)
}
 0x717   : > { %s1723_s0 = scalar_lea.hbm %s2437_s22, 128  ;;  %s1727_s3 = scalar_lea.hbm %s2621_s17, 256 }
 0x718   : > { %p1724_p3 = scmp.ne.s32.totalorder %s2437_s22, %s1723_s0  ;;  %p1728_p5 = scmp.lt.u32.totalorder %s2437_s22, %s2621_s17 }
 0x719   : > { %p1729_p9 = scmp.lt.u32.totalorder %s1727_s3, %s1723_s0  ;;  %p1731_p7 = scmp.lt.u32.totalorder %s1723_s0, %s2437_s22 }
 0x71a   : > { %p1725_p2 = pnand %p1724_p3, %p2622_p4 }
 0x71b   : > { %p1730_p6 = por %p1729_p9, %p1728_p5 }
 0x71c   : > { %p1726_p8 = pneg %p1725_p2 }
 0x71d   : > { %p1732_p10 = por %p1731_p7, %p1730_p6 }
 0x71f   : > { %p1733_p11 = pnand %p1732_p10, %p1726_p8 }
 0x721   : > { %1736 = shalt.err (!%p1733_p11)
}
 0x722   : > { %1341 = dma.vmem_to_hbm [thread:$0]  (%p2622_p4), %s1002_s11, 128, %s2437_s22, %s988_s21  }
 0x723 PF: > { %s2623_s15 = sld [smem:[#allocation26_spill]]  ;;  %s2624_s9 = sld [smem:[#allocation37_spill]] }
 0x724   : > { %p1377_p0 = scmp.ge.s32.totalorder %s1871_s14, 2 }
 0x729   : > { %s1013_s29 = sand.u32 1, %s2623_s15   ;;  %p2625_p1 = scmp.ne.s32.totalorder %s2624_s9, 0 }
 0x72a   : > { %s1014_s10 = scalar_lea.sflag [#allocation6], %s1013_s29 }
 0x72b   : > { %p1367_p13 = pnand %p1377_p0, %p2625_p1 }
 0x72d   : > { %1814 = dma.done.wait (!%p1367_p13), %s1014_s10, 128  }
 0x72e   : > { %1816 = vsyncadd (!%p1367_p13), %s1014_s10, 4294967168  ;;  %s28_s14 = sadd.s32 1, %s1871_s14   ;;  %s2627_s18 = sld [smem:[#allocation24_spill]] }
 0x72f   : > { %p2465_p12 = scmp.ge.s32.totalorder %s28_s14, 6   ;;  %s2628_s22 = smov %s2294_s24 }
 0x730   : > { %s2629_s11 = sld [smem:[#allocation25_spill]]  ;;  %s2630_s29 = sld [smem:[#allocation38_spill]] }
 0x731   : > { %s2631_s21 = sld [smem:[#allocation27_spill]]  ;;  %s2632_s9 = sld [smem:[#allocation36_spill]] }
 0x732   : > { %s2633_s20 = sld [smem:[#allocation31_spill]]  ;;  %s2634_s19 = sld [smem:[#allocation33_spill]] }
 0x733   : > { %s2636_s25 = smov %s1827_s26  ;;  %s2637_s26 = smov %s2628_s22 }
 0x734   : > { %s2635_s24 = smov %s2627_s18  ;;  %s2638_s27 = smov %s1835_s28 }
 0x735   : > { %s2640_s30 = smov %s1847_s8  ;;  %s2642_s10 = smov %s1863_s12 }
 0x736   : > { %s2639_s28 = smov %s2629_s11  ;;  %s2643_s11 = smov %s1867_s13 }
 0x737   : > { %s2641_s8 = smov %s2631_s21  ;;  %27 = sbr.rel (!%p2465_p12) target bundleno = 20 (0x14), region = 150 }
 0x738   : > { %s2644_s12 = smov %s2633_s20  ;;  %s2645_s13 = smov %s2634_s19 }
 0x73e   :  { %1019 = vsyncpa [#allocation5], 1 }
 0x73f   :  { %1021 = vsyncpa [#allocation5 + $0x1], 1 }
 0x740   :  { %1022 = vsyncpa [#allocation8], 1 }
 0x741   :  { %1023 = vsyncpa [#allocation11], 1 }
 0x742   :  { %1025 = vsyncpa [#allocation11 + $0x1], 1 }
 0x743   :  { %1026 = vsyncpa [#allocation14], 1 }
 0x744   :  { %1027 = vsyncpa [#allocation6], 1 }
 0x745   :  { %1029 = vsyncpa [#allocation6 + $0x1], 1 }

</bundles_post_ra>
